<compile_context>
chip_gen: v7x
topology: tpu7x:2x2x1
jax: 0.10.0
libtpu: 0.0.40
codegen_flags: <defaults>
</compile_context>

<pallas_src>
import jax
import jax.numpy as jnp
from jax import lax
from jax.experimental import pallas as pl
from jax.experimental.pallas import tpu as pltpu  # noqa: F401 (TPU backend)

# Small config (consistent with GPTConfig semantics)
B = 2          # batch
T = 8          # sequence length (block_size)
C = 32         # n_embed
N_HEAD = 4     # n_head
HD = C // N_HEAD
EPS = 1e-5
NEG = -1e30    # finite "masked" value (robust vs -inf; diagonal always unmasked)


def _layernorm(v, g, b):
    mu = jnp.mean(v, axis=-1, keepdims=True)
    var = jnp.mean((v - mu) ** 2, axis=-1, keepdims=True)
    return (v - mu) * lax.rsqrt(var + EPS) * g + b


def block_kernel(x_ref,
                 g1_ref, b1_ref,
                 wqkv_ref, bqkv_ref,
                 wpr_ref, bpr_ref,
                 g2_ref, b2_ref,
                 wfc_ref, bfc_ref,
                 wp2_ref, bp2_ref,
                 o_ref):
    x = x_ref[...]                                           # (B*T, C) f32

    # ---- ln_1 -------------------------------------------------------------
    h = _layernorm(x, g1_ref[...], b1_ref[...])              # f32 elementwise
    hb = h.astype(jnp.bfloat16)                              # bf16 MXU operand

    # ---- fused qkv projection: ONE wide matmul (N = 3C lanes) -------------
    # 1/sqrt(HD) is pre-folded into the q columns of wqkv / bqkv.
    qkv = jnp.dot(hb, wqkv_ref[...],
                  preferred_element_type=jnp.float32) + bqkv_ref[...]   # (B*T, 3C)

    # ---- regroup to head-batched layout (H*B, T, HD) -----------------------
    # Per-head lane slices stacked along a new leading dim; the (B*T,) ->
    # (B, T) split lands exactly on an 8-sublane tile boundary.
    def to_heads(off):
        parts = [qkv[:, off + hh * HD: off + (hh + 1) * HD].reshape(B, T, HD)
                 for hh in range(N_HEAD)]
        return jnp.stack(parts, axis=0).reshape(N_HEAD * B, T, HD).astype(jnp.bfloat16)

    q = to_heads(0)          # scale already folded into the weights
    k = to_heads(C)
    v = to_heads(2 * C)

    # ---- scores + causal softmax; mask generated in-kernel (no DMA) -------
    s = jnp.einsum('nqd,nkd->nqk', q, k,
                   preferred_element_type=jnp.float32)       # (H*B, T, T) f32
    row = lax.broadcasted_iota(jnp.int32, (T, T), 0)
    col = lax.broadcasted_iota(jnp.int32, (T, T), 1)
    s = s + jnp.where(row >= col, 0.0, NEG)                  # broadcast over batch
    m = jnp.max(s, axis=-1, keepdims=True)
    p = jnp.exp(s - m)                                       # f32 VPU/EUP
    p = p * pl.reciprocal(jnp.sum(p, axis=-1, keepdims=True), approx=True)

    o = jnp.einsum('nqk,nkd->nqd', p.astype(jnp.bfloat16), v,
                   preferred_element_type=jnp.float32)       # (H*B, T, HD) f32

    # ---- concat heads along lanes, then ONE c_proj contraction ------------
    o4 = o.reshape(N_HEAD, B, T, HD)
    o_cat = jnp.concatenate(
        [o4[hh].reshape(B * T, HD) for hh in range(N_HEAD)], axis=-1)  # (B*T, C)
    att = jnp.dot(o_cat.astype(jnp.bfloat16), wpr_ref[...],
                  preferred_element_type=jnp.float32)
    x1 = x + att + bpr_ref[...]

    # ---- ln_2 + MLP (GELU tanh) --------------------------------------------
    h2 = _layernorm(x1, g2_ref[...], b2_ref[...])
    f = jnp.dot(h2.astype(jnp.bfloat16), wfc_ref[...],
                preferred_element_type=jnp.float32) + bfc_ref[...]
    gl = 0.5 * f * (1.0 + jnp.tanh(0.7978845608028654 * (f + 0.044715 * f * f * f)))
    mlp = jnp.dot(gl.astype(jnp.bfloat16), wp2_ref[...],
                  preferred_element_type=jnp.float32) + bp2_ref[...]

    o_ref[...] = x1 + mlp                                    # single (B*T, C) store


def gpt_block(x, kernel_params):
    batch, t, c = x.shape
    xf = x.reshape(batch * t, c)          # row-wise ops are batch-agnostic
    out = pl.pallas_call(
        block_kernel,
        out_shape=jax.ShapeDtypeStruct((batch * t, c), jnp.float32),
        # Single no-grid invocation: whole problem resident in VMEM.
        # Output aliases the flattened-x input buffer (x is fully read before
        # the one final store), saving an HBM output allocation.
        input_output_aliases={0: 0},
    )(xf, *kernel_params)
    return out.reshape(batch, t, c)


# --------------------------- parameter handling ------------------------------
def make_canonical_params(key):
    """Params in the natural x @ W + b layout (PyTorch weights transposed)."""
    ks = jax.random.split(key, 8)
    def w(k, shape, scale=0.02):
        return (scale * jax.random.normal(k, shape)).astype(jnp.float32)
    g1 = jnp.ones((C,), jnp.float32); b1 = jnp.zeros((C,), jnp.float32)
    wqkv = w(ks[0], (C, 3 * C));      bqkv = w(ks[1], (3 * C,))
    wpr = w(ks[2], (C, C));           bpr = w(ks[3], (C,))
    g2 = jnp.ones((C,), jnp.float32); b2 = jnp.zeros((C,), jnp.float32)
    wfc = w(ks[4], (C, 4 * C));       bfc = w(ks[5], (4 * C,))
    wp2 = w(ks[6], (4 * C, C));       bp2 = w(ks[7], (C,))
    return (g1, b1, wqkv, bqkv, wpr, bpr, g2, b2, wfc, bfc, wp2, bp2)


def prep_kernel_params(cp):
    """Kernel layout: fused (C,3C) qkv weight with 1/sqrt(HD) folded into the q
    columns; bf16 MXU weights; f32 biases/LN params as (1, n) rows."""
    (g1, b1, wqkv, bqkv, wpr, bpr, g2, b2, wfc, bfc, wp2, bp2) = cp
    scale = HD ** -0.5
    scale_vec = jnp.concatenate([jnp.full((C,), scale, jnp.float32),
                                 jnp.ones((2 * C,), jnp.float32)])
    wqkv_s = (wqkv * scale_vec[None, :]).astype(jnp.bfloat16)      # (C, 3C)
    bqkv_s = (bqkv * scale_vec).reshape(1, 3 * C).astype(jnp.float32)

    return (g1.reshape(1, C), b1.reshape(1, C),
            wqkv_s, bqkv_s,
            wpr.astype(jnp.bfloat16), bpr.reshape(1, C),
            g2.reshape(1, C), b2.reshape(1, C),
            wfc.astype(jnp.bfloat16), bfc.reshape(1, 4 * C),
            wp2.astype(jnp.bfloat16), bp2.reshape(1, C))


# ------------------------------- reference -----------------------------------
def reference_block(x, cp):
    (g1, b1, wqkv, bqkv, wpr, bpr, g2, b2, wfc, bfc, wp2, bp2) = cp
    bq_, tq_, cq_ = x.shape
    h = _layernorm(x, g1, b1)
    qkv = h @ wqkv + bqkv
    q, k, v = jnp.split(qkv, 3, axis=-1)
    def heads(a):
        return a.reshape(bq_, tq_, N_HEAD, HD).transpose(0, 2, 1, 3)
    q, k, v = heads(q), heads(k), heads(v)
    s = jnp.einsum('bhqd,bhkd->bhqk', q, k) * (HD ** -0.5)
    mask = jnp.tril(jnp.ones((tq_, tq_), bool))
    s = jnp.where(mask, s, -jnp.inf)
    p = jax.nn.softmax(s, axis=-1)
    o = jnp.einsum('bhqk,bhkd->bhqd', p, v).transpose(0, 2, 1, 3).reshape(bq_, tq_, cq_)
    x1 = x + (o @ wpr + bpr)
    h2 = _layernorm(x1, g2, b2)
    f = h2 @ wfc + bfc
    gl = 0.5 * f * (1.0 + jnp.tanh(0.7978845608028654 * (f + 0.044715 * f ** 3)))
    return x1 + (gl @ wp2 + bp2)


if __name__ == "__main__":
    key = jax.random.PRNGKey(0)
    kx, kp = jax.random.split(key)
    x = jax.random.normal(kx, (B, T, C), dtype=jnp.float32)

    canon = make_canonical_params(kp)
    kparams = prep_kernel_params(canon)

    # Reference (pure f32) computed first; kernel output aliases only its own
    # internal flattened copy of x, so ordering is belt-and-braces.
    ref = reference_block(x, canon)

    run = jax.jit(gpt_block)
    out = run(x, kparams)
    jax.block_until_ready(out)

    assert out.shape == (B, T, C)
    err = float(jnp.max(jnp.abs(out - ref)))
    # bf16 MXU operands + approx reciprocal => bf16-level tolerance vs f32 ref
    assert err < 1e-2, f"mismatch vs reference: {err}"
    print("KERNEL_OK")
</pallas_src>

<mosaic_0001>
module attributes {stable_mosaic.version = 11 : i64} {
  func.func @block_kernel(%arg0: memref<16x32xf32, #tpu.memory_space<vmem>>, %arg1: memref<1x32xf32, #tpu.memory_space<vmem>>, %arg2: memref<1x32xf32, #tpu.memory_space<vmem>>, %arg3: memref<32x96xbf16, #tpu.memory_space<vmem>>, %arg4: memref<1x96xf32, #tpu.memory_space<vmem>>, %arg5: memref<32x32xbf16, #tpu.memory_space<vmem>>, %arg6: memref<1x32xf32, #tpu.memory_space<vmem>>, %arg7: memref<1x32xf32, #tpu.memory_space<vmem>>, %arg8: memref<1x32xf32, #tpu.memory_space<vmem>>, %arg9: memref<32x128xbf16, #tpu.memory_space<vmem>>, %arg10: memref<1x128xf32, #tpu.memory_space<vmem>>, %arg11: memref<128x32xbf16, #tpu.memory_space<vmem>>, %arg12: memref<1x32xf32, #tpu.memory_space<vmem>>, %arg13: memref<16x32xf32, #tpu.memory_space<vmem>>) attributes {dimension_semantics = [], scalar_prefetch = 0 : i64, scratch_operands = 0 : i64, tpu.core_type = #tpu.core_type<tc>} {
    %c0 = arith.constant 0 : index
    %c0_0 = arith.constant 0 : index
    %0 = vector.load %arg0[%c0, %c0_0] : memref<16x32xf32, #tpu.memory_space<vmem>>, vector<16x32xf32>
    %c0_1 = arith.constant 0 : index
    %c0_2 = arith.constant 0 : index
    %1 = vector.load %arg1[%c0_1, %c0_2] : memref<1x32xf32, #tpu.memory_space<vmem>>, vector<1x32xf32>
    %c0_3 = arith.constant 0 : index
    %c0_4 = arith.constant 0 : index
    %2 = vector.load %arg2[%c0_3, %c0_4] : memref<1x32xf32, #tpu.memory_space<vmem>>, vector<1x32xf32>
    %cst = arith.constant dense<0.000000e+00> : vector<16xf32>
    %3 = vector.multi_reduction <add>, %0, %cst [1] : vector<16x32xf32> to vector<16xf32>
    %4 = vector.shape_cast %3 : vector<16xf32> to vector<16x1xf32>
    %cst_5 = arith.constant 3.200000e+01 : f32
    %5 = vector.broadcast %cst_5 : f32 to vector<16x1xf32>
    %6 = arith.divf %4, %5 : vector<16x1xf32>
    %7 = vector.broadcast %6 : vector<16x1xf32> to vector<16x32xf32>
    %8 = arith.subf %0, %7 : vector<16x32xf32>
    %9 = arith.mulf %8, %8 : vector<16x32xf32>
    %cst_6 = arith.constant dense<0.000000e+00> : vector<16xf32>
    %10 = vector.multi_reduction <add>, %9, %cst_6 [1] : vector<16x32xf32> to vector<16xf32>
    %11 = vector.shape_cast %10 : vector<16xf32> to vector<16x1xf32>
    %cst_7 = arith.constant 3.200000e+01 : f32
    %12 = vector.broadcast %cst_7 : f32 to vector<16x1xf32>
    %13 = arith.divf %11, %12 : vector<16x1xf32>
    %14 = vector.broadcast %6 : vector<16x1xf32> to vector<16x32xf32>
    %15 = arith.subf %0, %14 : vector<16x32xf32>
    %cst_8 = arith.constant 9.99999974E-6 : f32
    %16 = vector.broadcast %cst_8 : f32 to vector<16x1xf32>
    %17 = arith.addf %13, %16 : vector<16x1xf32>
    %18 = math.rsqrt %17 : vector<16x1xf32>
    %19 = vector.broadcast %18 : vector<16x1xf32> to vector<16x32xf32>
    %20 = arith.mulf %15, %19 : vector<16x32xf32>
    %21 = vector.broadcast %1 : vector<1x32xf32> to vector<16x32xf32>
    %22 = arith.mulf %20, %21 : vector<16x32xf32>
    %23 = vector.broadcast %2 : vector<1x32xf32> to vector<16x32xf32>
    %24 = arith.addf %22, %23 : vector<16x32xf32>
    %25 = arith.truncf %24 : vector<16x32xf32> to vector<16x32xbf16>
    %c0_9 = arith.constant 0 : index
    %c0_10 = arith.constant 0 : index
    %26 = vector.load %arg3[%c0_9, %c0_10] : memref<32x96xbf16, #tpu.memory_space<vmem>>, vector<32x96xbf16>
    %cst_11 = arith.constant dense<0.000000e+00> : vector<16x96xf32>
    %27 = tpu.matmul %25, %26, %cst_11 {dimension_numbers = #tpu.dot_dimension_numbers<[1], [0], [0], [1], [0, 0, 1, 1], [], []>} : vector<16x32xbf16>, vector<32x96xbf16>, vector<16x96xf32> -> vector<16x96xf32>
    %c0_12 = arith.constant 0 : index
    %c0_13 = arith.constant 0 : index
    %28 = vector.load %arg4[%c0_12, %c0_13] : memref<1x96xf32, #tpu.memory_space<vmem>>, vector<1x96xf32>
    %29 = vector.broadcast %28 : vector<1x96xf32> to vector<16x96xf32>
    %30 = arith.addf %27, %29 : vector<16x96xf32>
    %31 = vector.extract_strided_slice %30 {offsets = [0, 0], sizes = [16, 8], strides = [1, 1]} : vector<16x96xf32> to vector<16x8xf32>
    %32 = vector.shape_cast %31 : vector<16x8xf32> to vector<2x8x8xf32>
    %33 = vector.extract_strided_slice %30 {offsets = [0, 8], sizes = [16, 8], strides = [1, 1]} : vector<16x96xf32> to vector<16x8xf32>
    %34 = vector.shape_cast %33 : vector<16x8xf32> to vector<2x8x8xf32>
    %35 = vector.extract_strided_slice %30 {offsets = [0, 16], sizes = [16, 8], strides = [1, 1]} : vector<16x96xf32> to vector<16x8xf32>
    %36 = vector.shape_cast %35 : vector<16x8xf32> to vector<2x8x8xf32>
    %37 = vector.extract_strided_slice %30 {offsets = [0, 24], sizes = [16, 8], strides = [1, 1]} : vector<16x96xf32> to vector<16x8xf32>
    %38 = vector.shape_cast %37 : vector<16x8xf32> to vector<2x8x8xf32>
    %39 = vector.shape_cast %32 : vector<2x8x8xf32> to vector<1x2x8x8xf32>
    %40 = vector.shape_cast %34 : vector<2x8x8xf32> to vector<1x2x8x8xf32>
    %41 = vector.shape_cast %36 : vector<2x8x8xf32> to vector<1x2x8x8xf32>
    %42 = vector.shape_cast %38 : vector<2x8x8xf32> to vector<1x2x8x8xf32>
    %43 = tpu.concatenate %39, %40, %41, %42 in 0 : vector<1x2x8x8xf32>, vector<1x2x8x8xf32>, vector<1x2x8x8xf32>, vector<1x2x8x8xf32> -> vector<4x2x8x8xf32>
    %44 = vector.shape_cast %43 : vector<4x2x8x8xf32> to vector<8x8x8xf32>
    %45 = arith.truncf %44 : vector<8x8x8xf32> to vector<8x8x8xbf16>
    %46 = vector.extract_strided_slice %30 {offsets = [0, 32], sizes = [16, 8], strides = [1, 1]} : vector<16x96xf32> to vector<16x8xf32>
    %47 = vector.shape_cast %46 : vector<16x8xf32> to vector<2x8x8xf32>
    %48 = vector.extract_strided_slice %30 {offsets = [0, 40], sizes = [16, 8], strides = [1, 1]} : vector<16x96xf32> to vector<16x8xf32>
    %49 = vector.shape_cast %48 : vector<16x8xf32> to vector<2x8x8xf32>
    %50 = vector.extract_strided_slice %30 {offsets = [0, 48], sizes = [16, 8], strides = [1, 1]} : vector<16x96xf32> to vector<16x8xf32>
    %51 = vector.shape_cast %50 : vector<16x8xf32> to vector<2x8x8xf32>
    %52 = vector.extract_strided_slice %30 {offsets = [0, 56], sizes = [16, 8], strides = [1, 1]} : vector<16x96xf32> to vector<16x8xf32>
    %53 = vector.shape_cast %52 : vector<16x8xf32> to vector<2x8x8xf32>
    %54 = vector.shape_cast %47 : vector<2x8x8xf32> to vector<1x2x8x8xf32>
    %55 = vector.shape_cast %49 : vector<2x8x8xf32> to vector<1x2x8x8xf32>
    %56 = vector.shape_cast %51 : vector<2x8x8xf32> to vector<1x2x8x8xf32>
    %57 = vector.shape_cast %53 : vector<2x8x8xf32> to vector<1x2x8x8xf32>
    %58 = tpu.concatenate %54, %55, %56, %57 in 0 : vector<1x2x8x8xf32>, vector<1x2x8x8xf32>, vector<1x2x8x8xf32>, vector<1x2x8x8xf32> -> vector<4x2x8x8xf32>
    %59 = vector.shape_cast %58 : vector<4x2x8x8xf32> to vector<8x8x8xf32>
    %60 = arith.truncf %59 : vector<8x8x8xf32> to vector<8x8x8xbf16>
    %61 = vector.extract_strided_slice %30 {offsets = [0, 64], sizes = [16, 8], strides = [1, 1]} : vector<16x96xf32> to vector<16x8xf32>
    %62 = vector.shape_cast %61 : vector<16x8xf32> to vector<2x8x8xf32>
    %63 = vector.extract_strided_slice %30 {offsets = [0, 72], sizes = [16, 8], strides = [1, 1]} : vector<16x96xf32> to vector<16x8xf32>
    %64 = vector.shape_cast %63 : vector<16x8xf32> to vector<2x8x8xf32>
    %65 = vector.extract_strided_slice %30 {offsets = [0, 80], sizes = [16, 8], strides = [1, 1]} : vector<16x96xf32> to vector<16x8xf32>
    %66 = vector.shape_cast %65 : vector<16x8xf32> to vector<2x8x8xf32>
    %67 = vector.extract_strided_slice %30 {offsets = [0, 88], sizes = [16, 8], strides = [1, 1]} : vector<16x96xf32> to vector<16x8xf32>
    %68 = vector.shape_cast %67 : vector<16x8xf32> to vector<2x8x8xf32>
    %69 = vector.shape_cast %62 : vector<2x8x8xf32> to vector<1x2x8x8xf32>
    %70 = vector.shape_cast %64 : vector<2x8x8xf32> to vector<1x2x8x8xf32>
    %71 = vector.shape_cast %66 : vector<2x8x8xf32> to vector<1x2x8x8xf32>
    %72 = vector.shape_cast %68 : vector<2x8x8xf32> to vector<1x2x8x8xf32>
    %73 = tpu.concatenate %69, %70, %71, %72 in 0 : vector<1x2x8x8xf32>, vector<1x2x8x8xf32>, vector<1x2x8x8xf32>, vector<1x2x8x8xf32> -> vector<4x2x8x8xf32>
    %74 = vector.shape_cast %73 : vector<4x2x8x8xf32> to vector<8x8x8xf32>
    %75 = arith.truncf %74 : vector<8x8x8xf32> to vector<8x8x8xbf16>
    "tpu.trace_start"() <{level = 10 : i32, message = "nqd,nkd->nqk"}> : () -> ()
    %cst_14 = arith.constant dense<0.000000e+00> : vector<8x8x8xf32>
    %76 = tpu.matmul %45, %60, %cst_14 {dimension_numbers = #tpu.dot_dimension_numbers<[2], [2], [1], [1], [0, 0, 0, 1, 1, 1], [0], [0]>} : vector<8x8x8xbf16>, vector<8x8x8xbf16>, vector<8x8x8xf32> -> vector<8x8x8xf32>
    "tpu.trace_stop"() : () -> ()
    %77 = tpu.iota {dimensions = array<i32: 0>} : vector<8x8xi32>
    %78 = tpu.iota {dimensions = array<i32: 1>} : vector<8x8xi32>
    %79 = arith.cmpi sge, %77, %78 : vector<8x8xi32>
    %cst_15 = arith.constant 0.000000e+00 : f32
    %cst_16 = arith.constant -1.000000e+30 : f32
    %80 = vector.broadcast %cst_15 : f32 to vector<8x8xf32>
    %81 = vector.broadcast %cst_16 : f32 to vector<8x8xf32>
    %82 = arith.select %79, %80, %81 : vector<8x8xi1>, vector<8x8xf32>
    %83 = vector.shape_cast %82 : vector<8x8xf32> to vector<1x8x8xf32>
    %84 = vector.broadcast %83 : vector<1x8x8xf32> to vector<8x8x8xf32>
    %85 = arith.addf %76, %84 : vector<8x8x8xf32>
    %cst_17 = arith.constant dense<0xFF800000> : vector<8x8xf32>
    %86 = vector.multi_reduction <maximumf>, %85, %cst_17 [2] : vector<8x8x8xf32> to vector<8x8xf32>
    %87 = vector.shape_cast %86 : vector<8x8xf32> to vector<8x8x1xf32>
    %88 = vector.broadcast %87 : vector<8x8x1xf32> to vector<8x8x8xf32>
    %89 = arith.subf %85, %88 : vector<8x8x8xf32>
    %90 = math.exp %89 : vector<8x8x8xf32>
    %cst_18 = arith.constant dense<0.000000e+00> : vector<8x8xf32>
    %91 = vector.multi_reduction <add>, %90, %cst_18 [2] : vector<8x8x8xf32> to vector<8x8xf32>
    %92 = vector.shape_cast %91 : vector<8x8xf32> to vector<8x8x1xf32>
    %93 = tpu.reciprocal %92 {approx = true} : vector<8x8x1xf32> -> vector<8x8x1xf32>
    %94 = vector.broadcast %93 : vector<8x8x1xf32> to vector<8x8x8xf32>
    %95 = arith.mulf %90, %94 : vector<8x8x8xf32>
    %96 = arith.truncf %95 : vector<8x8x8xf32> to vector<8x8x8xbf16>
    "tpu.trace_start"() <{level = 10 : i32, message = "nqk,nkd->nqd"}> : () -> ()
    %cst_19 = arith.constant dense<0.000000e+00> : vector<8x8x8xf32>
    %97 = tpu.matmul %96, %75, %cst_19 {dimension_numbers = #tpu.dot_dimension_numbers<[2], [1], [1], [2], [0, 0, 0, 1, 1, 2], [0], [0]>} : vector<8x8x8xbf16>, vector<8x8x8xbf16>, vector<8x8x8xf32> -> vector<8x8x8xf32>
    "tpu.trace_stop"() : () -> ()
    %98 = vector.shape_cast %97 : vector<8x8x8xf32> to vector<4x2x8x8xf32>
    %99 = vector.extract_strided_slice %98 {offsets = [0, 0, 0, 0], sizes = [1, 2, 8, 8], strides = [1, 1, 1, 1]} : vector<4x2x8x8xf32> to vector<1x2x8x8xf32>
    %100 = vector.shape_cast %99 : vector<1x2x8x8xf32> to vector<2x8x8xf32>
    %101 = vector.shape_cast %100 : vector<2x8x8xf32> to vector<16x8xf32>
    %102 = vector.extract_strided_slice %98 {offsets = [1, 0, 0, 0], sizes = [1, 2, 8, 8], strides = [1, 1, 1, 1]} : vector<4x2x8x8xf32> to vector<1x2x8x8xf32>
    %103 = vector.shape_cast %102 : vector<1x2x8x8xf32> to vector<2x8x8xf32>
    %104 = vector.shape_cast %103 : vector<2x8x8xf32> to vector<16x8xf32>
    %105 = vector.extract_strided_slice %98 {offsets = [2, 0, 0, 0], sizes = [1, 2, 8, 8], strides = [1, 1, 1, 1]} : vector<4x2x8x8xf32> to vector<1x2x8x8xf32>
    %106 = vector.shape_cast %105 : vector<1x2x8x8xf32> to vector<2x8x8xf32>
    %107 = vector.shape_cast %106 : vector<2x8x8xf32> to vector<16x8xf32>
    %108 = vector.extract_strided_slice %98 {offsets = [3, 0, 0, 0], sizes = [1, 2, 8, 8], strides = [1, 1, 1, 1]} : vector<4x2x8x8xf32> to vector<1x2x8x8xf32>
    %109 = vector.shape_cast %108 : vector<1x2x8x8xf32> to vector<2x8x8xf32>
    %110 = vector.shape_cast %109 : vector<2x8x8xf32> to vector<16x8xf32>
    %111 = tpu.concatenate %101, %104, %107, %110 in 1 : vector<16x8xf32>, vector<16x8xf32>, vector<16x8xf32>, vector<16x8xf32> -> vector<16x32xf32>
    %112 = arith.truncf %111 : vector<16x32xf32> to vector<16x32xbf16>
    %c0_20 = arith.constant 0 : index
    %c0_21 = arith.constant 0 : index
    %113 = vector.load %arg5[%c0_20, %c0_21] : memref<32x32xbf16, #tpu.memory_space<vmem>>, vector<32x32xbf16>
    %cst_22 = arith.constant dense<0.000000e+00> : vector<16x32xf32>
    %114 = tpu.matmul %112, %113, %cst_22 {dimension_numbers = #tpu.dot_dimension_numbers<[1], [0], [0], [1], [0, 0, 1, 1], [], []>} : vector<16x32xbf16>, vector<32x32xbf16>, vector<16x32xf32> -> vector<16x32xf32>
    %115 = arith.addf %0, %114 : vector<16x32xf32>
    %c0_23 = arith.constant 0 : index
    %c0_24 = arith.constant 0 : index
    %116 = vector.load %arg6[%c0_23, %c0_24] : memref<1x32xf32, #tpu.memory_space<vmem>>, vector<1x32xf32>
    %117 = vector.broadcast %116 : vector<1x32xf32> to vector<16x32xf32>
    %118 = arith.addf %115, %117 : vector<16x32xf32>
    %c0_25 = arith.constant 0 : index
    %c0_26 = arith.constant 0 : index
    %119 = vector.load %arg7[%c0_25, %c0_26] : memref<1x32xf32, #tpu.memory_space<vmem>>, vector<1x32xf32>
    %c0_27 = arith.constant 0 : index
    %c0_28 = arith.constant 0 : index
    %120 = vector.load %arg8[%c0_27, %c0_28] : memref<1x32xf32, #tpu.memory_space<vmem>>, vector<1x32xf32>
    %cst_29 = arith.constant dense<0.000000e+00> : vector<16xf32>
    %121 = vector.multi_reduction <add>, %118, %cst_29 [1] : vector<16x32xf32> to vector<16xf32>
    %122 = vector.shape_cast %121 : vector<16xf32> to vector<16x1xf32>
    %cst_30 = arith.constant 3.200000e+01 : f32
    %123 = vector.broadcast %cst_30 : f32 to vector<16x1xf32>
    %124 = arith.divf %122, %123 : vector<16x1xf32>
    %125 = vector.broadcast %124 : vector<16x1xf32> to vector<16x32xf32>
    %126 = arith.subf %118, %125 : vector<16x32xf32>
    %127 = arith.mulf %126, %126 : vector<16x32xf32>
    %cst_31 = arith.constant dense<0.000000e+00> : vector<16xf32>
    %128 = vector.multi_reduction <add>, %127, %cst_31 [1] : vector<16x32xf32> to vector<16xf32>
    %129 = vector.shape_cast %128 : vector<16xf32> to vector<16x1xf32>
    %cst_32 = arith.constant 3.200000e+01 : f32
    %130 = vector.broadcast %cst_32 : f32 to vector<16x1xf32>
    %131 = arith.divf %129, %130 : vector<16x1xf32>
    %132 = vector.broadcast %124 : vector<16x1xf32> to vector<16x32xf32>
    %133 = arith.subf %118, %132 : vector<16x32xf32>
    %cst_33 = arith.constant 9.99999974E-6 : f32
    %134 = vector.broadcast %cst_33 : f32 to vector<16x1xf32>
    %135 = arith.addf %131, %134 : vector<16x1xf32>
    %136 = math.rsqrt %135 : vector<16x1xf32>
    %137 = vector.broadcast %136 : vector<16x1xf32> to vector<16x32xf32>
    %138 = arith.mulf %133, %137 : vector<16x32xf32>
    %139 = vector.broadcast %119 : vector<1x32xf32> to vector<16x32xf32>
    %140 = arith.mulf %138, %139 : vector<16x32xf32>
    %141 = vector.broadcast %120 : vector<1x32xf32> to vector<16x32xf32>
    %142 = arith.addf %140, %141 : vector<16x32xf32>
    %143 = arith.truncf %142 : vector<16x32xf32> to vector<16x32xbf16>
    %c0_34 = arith.constant 0 : index
    %c0_35 = arith.constant 0 : index
    %144 = vector.load %arg9[%c0_34, %c0_35] : memref<32x128xbf16, #tpu.memory_space<vmem>>, vector<32x128xbf16>
    %cst_36 = arith.constant dense<0.000000e+00> : vector<16x128xf32>
    %145 = tpu.matmul %143, %144, %cst_36 {dimension_numbers = #tpu.dot_dimension_numbers<[1], [0], [0], [1], [0, 0, 1, 1], [], []>} : vector<16x32xbf16>, vector<32x128xbf16>, vector<16x128xf32> -> vector<16x128xf32>
    %c0_37 = arith.constant 0 : index
    %c0_38 = arith.constant 0 : index
    %146 = vector.load %arg10[%c0_37, %c0_38] : memref<1x128xf32, #tpu.memory_space<vmem>>, vector<1x128xf32>
    %147 = vector.broadcast %146 : vector<1x128xf32> to vector<16x128xf32>
    %148 = arith.addf %145, %147 : vector<16x128xf32>
    %cst_39 = arith.constant 5.000000e-01 : f32
    %149 = vector.broadcast %cst_39 : f32 to vector<16x128xf32>
    %150 = arith.mulf %149, %148 : vector<16x128xf32>
    %cst_40 = arith.constant 4.471500e-02 : f32
    %151 = vector.broadcast %cst_40 : f32 to vector<16x128xf32>
    %152 = arith.mulf %151, %148 : vector<16x128xf32>
    %153 = arith.mulf %152, %148 : vector<16x128xf32>
    %154 = arith.mulf %153, %148 : vector<16x128xf32>
    %155 = arith.addf %148, %154 : vector<16x128xf32>
    %cst_41 = arith.constant 0.797884583 : f32
    %156 = vector.broadcast %cst_41 : f32 to vector<16x128xf32>
    %157 = arith.mulf %156, %155 : vector<16x128xf32>
    %158 = math.tanh %157 : vector<16x128xf32>
    %cst_42 = arith.constant 1.000000e+00 : f32
    %159 = vector.broadcast %cst_42 : f32 to vector<16x128xf32>
    %160 = arith.addf %159, %158 : vector<16x128xf32>
    %161 = arith.mulf %150, %160 : vector<16x128xf32>
    %162 = arith.truncf %161 : vector<16x128xf32> to vector<16x128xbf16>
    %c0_43 = arith.constant 0 : index
    %c0_44 = arith.constant 0 : index
    %163 = vector.load %arg11[%c0_43, %c0_44] : memref<128x32xbf16, #tpu.memory_space<vmem>>, vector<128x32xbf16>
    %cst_45 = arith.constant dense<0.000000e+00> : vector<16x32xf32>
    %164 = tpu.matmul %162, %163, %cst_45 {dimension_numbers = #tpu.dot_dimension_numbers<[1], [0], [0], [1], [0, 0, 1, 1], [], []>} : vector<16x128xbf16>, vector<128x32xbf16>, vector<16x32xf32> -> vector<16x32xf32>
    %c0_46 = arith.constant 0 : index
    %c0_47 = arith.constant 0 : index
    %165 = vector.load %arg12[%c0_46, %c0_47] : memref<1x32xf32, #tpu.memory_space<vmem>>, vector<1x32xf32>
    %166 = vector.broadcast %165 : vector<1x32xf32> to vector<16x32xf32>
    %167 = arith.addf %164, %166 : vector<16x32xf32>
    %168 = arith.addf %118, %167 : vector<16x32xf32>
    %c0_48 = arith.constant 0 : index
    %c0_49 = arith.constant 0 : index
    %169 = vector.load %arg13[%c0_48, %c0_49] : memref<16x32xf32, #tpu.memory_space<vmem>>, vector<16x32xf32>
    tpu.vector_store %arg13[%c0_48, %c0_49], %168 {strides = array<i32>} : memref<16x32xf32, #tpu.memory_space<vmem>>, vector<16x32xf32>,
    return
  }
}

</mosaic_0001>

<bundles_post_ra>
// kernel: gpt_block.1
= control target key start
LH: loop header
LB: loop body
LE: loop exit
PB: predicated region body
PF: predicated region fallthrough
CT: control target
= control target key end

     0   :  { %vm49_vm0 = vcmask 261120   ;;  %v1754_v15 = vmov 0.0   ;;  %vm1755_vm1 = vmmov 0   ;;  %s1758_s20 = smov 104   ;;  %s1759_s21 = smov 96   ;;  %vm198_vm2 = vcmask 64512   ;;  %s2149_s0 = inlined_call_operand.vmem [shape: f32[16,32], index: 0, kind: input, shape index: {}, may-alias: {0,13}]   ;;  %s2150_s3 = inlined_call_operand.vmem [shape: bf16[32,96], index: 3, kind: input, shape index: {}]   ;;  %s2151_s1 = inlined_call_operand.vmem [shape: f32[1,32], index: 1, kind: input, shape index: {}]   ;;  %s2152_s2 = inlined_call_operand.vmem [shape: f32[1,32], index: 2, kind: input, shape index: {}]   ;;  %s2153_s4 = inlined_call_operand.vmem [shape: f32[1,96], index: 4, kind: input, shape index: {}]   ;;  %s2154_s5 = inlined_call_operand.vmem [shape: bf16[32,32], index: 5, kind: input, shape index: {}]   ;;  %s2155_s6 = inlined_call_operand.vmem [shape: f32[1,32], index: 6, kind: input, shape index: {}]   ;;  %s2156_s9 = inlined_call_operand.vmem [shape: bf16[32,128], index: 9, kind: input, shape index: {}]   ;;  %s2157_s7 = inlined_call_operand.vmem [shape: f32[1,32], index: 7, kind: input, shape index: {}]   ;;  %s2158_s8 = inlined_call_operand.vmem [shape: f32[1,32], index: 8, kind: input, shape index: {}]   ;;  %s2159_s11 = inlined_call_operand.vmem [shape: bf16[128,32], index: 11, kind: input, shape index: {}]   ;;  %s2160_s10 = inlined_call_operand.vmem [shape: f32[1,128], index: 10, kind: input, shape index: {}]   ;;  %s2161_s12 = inlined_call_operand.vmem [shape: f32[1,32], index: 12, kind: input, shape index: {}]   ;;  %s2162_s13 = inlined_call_operand.vmem [shape: f32[16,32], index: 13, kind: output, shape index: {}, may-alias: {0,13}]  }
   0x1   :  { %v1838_v0 = vld [vmem:[%s2149_s0] sm:$0xff]  ;;  %v1843_v1 = vld [vmem:[%s2149_s0 + $0x8] sm:$0xff]  ;;  %1515 = vmatprep.subr.bf16.mxu0 %v1754_v15  ;;  %1535 = vmatprep.subr.bf16.mxu1 %v1754_v15  ;;  %vm689_vm3 = vcmask 1043456   ;;  %s1762_s22 = smov 8   ;;  %s1763_s27 = smov 16   ;;  %vm1095_vm5 = vcmask 130048  }
   0x2   :  { %v50_v2 = vsel %vm49_vm0, %v1838_v0, 0.0  ;;  %v53_v3 = vsel %vm49_vm0, %v1843_v1, 0.0  ;;  %v1696_v14 = vld [vmem:[%s2150_s3] sm:$0xff]   ;;  %v1697_v16 = vld [vmem:[%s2150_s3 + $0x8] sm:$0xff]   ;;  %1519 = vmatprep.mubr.msk.bf16.mxu0 %vm1755_vm1, %v1754_v15  ;;  %1537 = vmatprep.mubr.msk.bf16.mxu1 %vm1755_vm1, %v1754_v15  ;;  %s1764_s28 = smov 24   ;;  %vm1098_vm6 = vcmask 195584  }
   0x3   :  { %51 = vadd.xlane.f32.xlu0 %v50_v2  ;;  %1516 = vmatpush3.bf16.msra.mxu0 %v1696_v14  ;;  %v1424_v25 = vld [vmem:[%s2151_s1] ss:$0 sm:$0xff]  ;;  %s1756_s1 = smov 112  }
   0x4   :  { %1517 = vmatprep.subr.bf16.mxu0 %v1754_v15  ;;  %v1425_v29 = vld [vmem:[%s2152_s2] ss:$0 sm:$0xff]  ;;  %s1757_s2 = smov 120  }
   0x5   :  { %v1426_v34 = vld [vmem:[%s2153_s4] ss:$0 sm:$0xff]  ;;  %s1760_s4 = smov 64  }
   0x7   :  { %54 = vadd.xlane.f32.xlu0 %v53_v3  ;;  %1518 = vmatpush3.bf16.msra.mxu0 %v1697_v16  ;;  %v189_v16 = vlaneseq }
   0x8   :  { %1523 = vmatprep.subr.bf16.mxu0 %v1754_v15 }
  0x90   :  { %v52_v4 = vpop.xlane.xlu0 %51 }
  0x91   :  { %v57_v5 = vmul.f32 0.03125, %v52_v4 }
  0x93   :  { %v59_v6 = vsub.f32 %v1838_v0, %v57_v5 }
  0x94   :  { %v55_v7 = vpop.xlane.xlu0 %54 }
  0x95   :  { %v58_v8 = vmul.f32 0.03125, %v55_v7  ;;  %v61_v9 = vmul.f32 %v59_v6, %v59_v6 }
  0x97   :  { %v60_v10 = vsub.f32 %v1843_v1, %v58_v8  ;;  %v63_v11 = vsel %vm49_vm0, %v61_v9, 0.0 }
  0x98   :  { %64 = vadd.xlane.f32.xlu1 %v63_v11 }
  0x99   :  { %v62_v12 = vmul.f32 %v60_v10, %v60_v10 }
  0x9b   :  { %v66_v13 = vsel %vm49_vm0, %v62_v12, 0.0 }
  0x9c   :  { %67 = vadd.xlane.f32.xlu1 %v66_v13 }
 0x125   :  { %v65_v17 = vpop.xlane.xlu1 %64 }
 0x126   :  { %v69_v18 = vmul.f32 0.03125, %v65_v17  ;;  %v190_v17 = vshrl.u32 %v189_v16, 7 }
 0x128   :  { %v71_v19 = vadd.f32 1e-05, %v69_v18  ;;  %v192_v18 = vand.u32 127, %v189_v16 }
 0x129   :  { %v68_v20 = vpop.xlane.xlu1 %67 }
 0x12a   :  { %1710 = vrsqrt.f32 %v71_v19  ;;  %v70_v21 = vmul.f32 0.03125, %v68_v20  ;;  %vm193_vm4 = vcmp.ge.s32.totalorder %v190_v17, %v192_v18  ;;  %v1761_v19 = vmov -1e+30  }
 0x12b   :  { %v194_v20 = vsel %vm193_vm4, 0.0, %v1761_v19 }
 0x12c   :  { %v72_v22 = vadd.f32 1e-05, %v70_v21 }
 0x12e   :  { %1712 = vrsqrt.f32 %v72_v22 }
 0x134   :  { %v1711_v23 = vpop.eup %1710 }
 0x135   :  { %v75_v24 = vmul.f32 %v1711_v23, %v59_v6 }
 0x137   :  { %v83_v28 = vmul.f32 %v1424_v25, %v75_v24 }
 0x138   :  { %v1713_v26 = vpop.eup %1712 }
 0x139   :  { %v76_v27 = vmul.f32 %v1713_v26, %v60_v10  ;;  %v91_v31 = vadd.f32 %v1425_v29, %v83_v28 }
 0x13b   :  { %v84_v30 = vmul.f32 %v1424_v25, %v76_v27 }
 0x13d   :  { %v92_v32 = vadd.f32 %v1425_v29, %v84_v30 }
 0x13f   :  { %v93_v33 = vpack.c.bf16 %v92_v32, %v91_v31 }
 0x141   :  { %1520 = vmatmul.mubr.msk.bf16.vlgmr.msra.gmra.mrb[0].mxu0 %vm49_vm0, %v93_v33 }
 0x142   :  { %1525 = vmatprep.mubr.msk.bf16.mxu0 %vm1755_vm1, %v1754_v15 }
 0x214   :  { %v154_v35 = vpop.f32.mrb[0].mxu0 }
 0x215   :  { %v1521_v36 = vpop.f32.mrb[1].mxu0  ;;  %v155_v38 = vadd.f32 %v1426_v34, %v154_v35 }
 0x216   :  { %v157_v37 = vpop.f32.mrb[2].mxu0 }
 0x217   :  { %v158_v39 = vadd.f32 %v1426_v34, %v157_v37  ;;  %v1522_v40 = vpop.f32.mrb[3].mxu0  ;;  %v181_v43 = vpack.c.bf16 %v155_v38, %v155_v38 }
 0x219   :  { %v1671_v41 = vpack.i.bf16 %v158_v39, %v155_v38  ;;  %v1879_v42 = vpack.c.bf16 %v158_v39, %v158_v39 }
 0x21b   :  { %1672 = vrot.lane.b32.xlu1 %v1671_v41, %s1756_s1  ;;  %1667 = vrot.lane.b32.xlu0 %v1671_v41, %s1757_s2 }
 0x21f   :  { %1677 = vrot.lane.b32.xlu1 %v1671_v41, %s1758_s20  ;;  %246 = vrot.lane.b32.xlu0 %v1879_v42, %s1759_s21 }
 0x223   :  { %196 = vrot.lane.b32.xlu1 %v181_v43, %s1759_s21 }
 0x28d   :  { %v1673_v44 = vpop.permute.xlu1 %1672  ;;  %v1668_v45 = vpop.permute.xlu0 %1667 }
 0x28e   :  { %v1670_v46 = vunpack.i.h.bf16 %v1668_v45  ;;  %v1669_v47 = vunpack.i.l.bf16 %v1668_v45  ;;  %v1675_v48 = vunpack.i.h.bf16 %v1673_v44  ;;  %v1674_v49 = vunpack.i.l.bf16 %v1673_v44 }
 0x290   :  { %v1882_v50 = vpack.c.bf16 %v1670_v46, %v1670_v46  ;;  %v1884_v51 = vpack.c.bf16 %v1669_v47, %v1669_v47  ;;  %v1888_v53 = vpack.c.bf16 %v1675_v48, %v1675_v48  ;;  %v1890_v54 = vpack.c.bf16 %v1674_v49, %v1674_v49 }
 0x291   :  { %v1678_v52 = vpop.permute.xlu1 %1677  ;;  %v247_v61 = vpop.permute.xlu0 %246 }
 0x292   :  { %295 = vrot.lane.b32.xlu1 %v1884_v51, %s1759_s21  ;;  %344 = vrot.lane.b32.xlu0 %v1882_v50, %s1759_s21  ;;  %v1680_v55 = vunpack.i.h.bf16 %v1678_v52  ;;  %v1679_v56 = vunpack.i.l.bf16 %v1678_v52  ;;  %v252_v62 = vsel %vm198_vm2, %v247_v61, 0 }
 0x294   :  { %v1895_v59 = vpack.c.bf16 %v1680_v55, %v1680_v55  ;;  %v1897_v60 = vpack.c.bf16 %v1679_v56, %v1679_v56 }
 0x295   :  { %v197_v57 = vpop.permute.xlu1 %196 }
 0x296   :  { %v203_v58 = vsel %vm198_vm2, %v197_v57, 0  ;;  %393 = vrot.lane.b32.xlu1 %v1890_v54, %s1759_s21  ;;  %442 = vrot.lane.b32.xlu0 %v1888_v53, %s1759_s21 }
 0x297   :  { %1524 = vmatpush3.bf16.xpose.msra.mxu0 %v203_v58 }
 0x298   :  { %1529 = vmatprep.subr.bf16.mxu0 %v1754_v15 }
 0x29a   :  { %491 = vrot.lane.b32.xlu1 %v1897_v60, %s1759_s21  ;;  %540 = vrot.lane.b32.xlu0 %v1895_v59, %s1759_s21 }
 0x29e   :  { %1526 = vmatmul.mubr.msk.bf16.vlgmr.msra.gmra.mrb[4].mxu0 %vm198_vm2, %v181_v43  ;;  %684 = vrot.lane.b32.xlu1 %v181_v43, %s1760_s4 }
 0x29f   :  { %1530 = vmatpush3.bf16.xpose.msra.mxu0 %v252_v62  ;;  %1531 = vmatprep.mubr.msk.bf16.mxu0 %vm1755_vm1, %v1754_v15 }
 0x2a0   :  { %1541 = vmatprep.subr.bf16.mxu0 %v1754_v15 }
 0x2a6   :  { %1532 = vmatmul.mubr.msk.bf16.vlgmr.msra.gmra.mrb[8].mxu0 %vm198_vm2, %v1879_v42 }
 0x2a7   :  { %1543 = vmatprep.mubr.msk.bf16.mxu0 %vm1755_vm1, %v1754_v15 }
 0x304   :  { %v296_v63 = vpop.permute.xlu1 %295  ;;  %v345_v2 = vpop.permute.xlu0 %344 }
 0x305   :  { %v350_v3 = vsel %vm198_vm2, %v345_v2, 0  ;;  %v301_v4 = vsel %vm198_vm2, %v296_v63, 0 }
 0x306   :  { %1536 = vmatpush3.bf16.xpose.msra.mxu1 %v301_v4  ;;  %1542 = vmatpush3.bf16.xpose.msra.mxu0 %v350_v3 }
 0x307   :  { %1547 = vmatprep.subr.bf16.mxu1 %v1754_v15  ;;  %1553 = vmatprep.subr.bf16.mxu0 %v1754_v15 }
 0x308   :  { %v394_v5 = vpop.permute.xlu1 %393  ;;  %v443_v6 = vpop.permute.xlu0 %442 }
 0x309   :  { %v399_v7 = vsel %vm198_vm2, %v394_v5, 0  ;;  %v448_v8 = vsel %vm198_vm2, %v443_v6, 0 }
 0x30c   :  { %v492_v9 = vpop.permute.xlu1 %491  ;;  %v541_v10 = vpop.permute.xlu0 %540 }
 0x30d   :  { %1538 = vmatmul.mubr.msk.bf16.vlgmr.msra.gmra.mrb[0].mxu1 %vm198_vm2, %v1884_v51  ;;  %1544 = vmatmul.mubr.msk.bf16.vlgmr.msra.gmra.mrb[12].mxu0 %vm198_vm2, %v1882_v50  ;;  %v497_v11 = vsel %vm198_vm2, %v492_v9, 0  ;;  %v546_v12 = vsel %vm198_vm2, %v541_v10, 0 }
 0x30e   :  { %1548 = vmatpush3.bf16.xpose.msra.mxu1 %v399_v7  ;;  %1554 = vmatpush3.bf16.xpose.msra.mxu0 %v448_v8 }
 0x30f   :  { %1549 = vmatprep.mubr.msk.bf16.mxu1 %vm1755_vm1, %v1754_v15  ;;  %1555 = vmatprep.mubr.msk.bf16.mxu0 %vm1755_vm1, %v1754_v15 }
 0x310   :  { %1559 = vmatprep.subr.bf16.mxu1 %v1754_v15  ;;  %1565 = vmatprep.subr.bf16.mxu0 %v1754_v15  ;;  %v685_v13 = vpop.permute.xlu1 %684 }
 0x311   :  { %v691_v14 = vsel %vm689_vm3, %v685_v13, 0 }
 0x315   :  { %1550 = vmatmul.mubr.msk.bf16.vlgmr.msra.gmra.mrb[4].mxu1 %vm198_vm2, %v1890_v54  ;;  %1556 = vmatmul.mubr.msk.bf16.vlgmr.msra.gmra.mrb[16].mxu0 %vm198_vm2, %v1888_v53 }
 0x316   :  { %1560 = vmatpush3.bf16.xpose.msra.mxu1 %v497_v11  ;;  %1566 = vmatpush3.bf16.xpose.msra.mxu0 %v546_v12 }
 0x317   :  { %1561 = vmatprep.mubr.msk.bf16.mxu1 %vm1755_vm1, %v1754_v15  ;;  %1567 = vmatprep.mubr.msk.bf16.mxu0 %vm1755_vm1, %v1754_v15 }
 0x318   :  { %1571 = vmatprep.subr.bf16.mxu1 %v1754_v15  ;;  %1577 = vmatprep.subr.bf16.mxu0 %v1754_v15 }
 0x31d   :  { %1562 = vmatmul.mubr.msk.bf16.vlgmr.msra.gmra.mrb[8].mxu1 %vm198_vm2, %v1897_v60  ;;  %1568 = vmatmul.mubr.msk.bf16.vlgmr.msra.gmra.mrb[20].mxu0 %vm198_vm2, %v1895_v59 }
 0x31e   :  { %1572 = vmatpush3.bf16.msra.mxu1 %v691_v14  ;;  %1579 = vmatprep.mubr.msk.bf16.mxu0 %vm1755_vm1, %v1754_v15 }
 0x31f   :  { %1573 = vmatprep.mubr.msk.bf16.mxu1 %vm1755_vm1, %v1754_v15  ;;  %1583 = vmatprep.subr.bf16.mxu1 %v1754_v15 }
 0x371   :  { %v239_v21 = vpop.f32.mrb[4].mxu0 }
 0x372   :  { %v1950_v22 = vadd.f32 %v239_v21, %v194_v20  ;;  %v1527_v23 = vpop.f32.mrb[5].mxu0 }
 0x373   :  { %v242_v24 = vpop.f32.mrb[6].mxu0 }
 0x374   :  { %v1528_v25 = vpop.f32.mrb[7].mxu0  ;;  %v588_v26 = vsel %vm198_vm2, %v1950_v22, -inf }
 0x375   :  { %589 = vmax.xlane.f32.xlu1 %v588_v26 }
 0x379   :  { %v288_v27 = vpop.f32.mrb[8].mxu0 }
 0x37a   :  { %v289_v28 = vadd.f32 %v288_v27, %v194_v20  ;;  %v1533_v29 = vpop.f32.mrb[9].mxu0 }
 0x37b   :  { %v291_v30 = vpop.f32.mrb[10].mxu0 }
 0x37c   :  { %v1534_v31 = vpop.f32.mrb[11].mxu0  ;;  %v591_v32 = vsel %vm198_vm2, %v289_v28, -inf }
 0x37d   :  { %592 = vmax.xlane.f32.xlu0 %v591_v32 }
 0x3e0   :  { %v337_v33 = vpop.f32.mrb[0].mxu1  ;;  %v386_v34 = vpop.f32.mrb[12].mxu0 }
 0x3e1   :  { %v338_v35 = vadd.f32 %v337_v33, %v194_v20  ;;  %v1539_v36 = vpop.f32.mrb[1].mxu1  ;;  %v1545_v37 = vpop.f32.mrb[13].mxu0  ;;  %v387_v40 = vadd.f32 %v386_v34, %v194_v20 }
 0x3e2   :  { %v340_v38 = vpop.f32.mrb[2].mxu1  ;;  %v389_v39 = vpop.f32.mrb[14].mxu0 }
 0x3e3   :  { %v1540_v41 = vpop.f32.mrb[3].mxu1  ;;  %v1546_v43 = vpop.f32.mrb[15].mxu0  ;;  %v594_v44 = vsel %vm198_vm2, %v338_v35, -inf  ;;  %v597_v45 = vsel %vm198_vm2, %v387_v40, -inf }
 0x3e4   :  { %595 = vmax.xlane.f32.xlu0 %v594_v44 }
 0x3e8   :  { %v435_v46 = vpop.f32.mrb[4].mxu1  ;;  %598 = vmax.xlane.f32.xlu0 %v597_v45  ;;  %v484_v47 = vpop.f32.mrb[16].mxu0 }
 0x3e9   :  { %v436_v48 = vadd.f32 %v435_v46, %v194_v20  ;;  %v1957_v49 = vadd.f32 %v484_v47, %v194_v20  ;;  %v1551_v52 = vpop.f32.mrb[5].mxu1  ;;  %v1557_v55 = vpop.f32.mrb[17].mxu0 }
 0x3ea   :  { %v438_v56 = vpop.f32.mrb[6].mxu1  ;;  %v487_v57 = vpop.f32.mrb[18].mxu0 }
 0x3eb   :  { %v1552_v58 = vpop.f32.mrb[7].mxu1  ;;  %v1558_v61 = vpop.f32.mrb[19].mxu0  ;;  %v600_v62 = vsel %vm198_vm2, %v436_v48, -inf  ;;  %v603_v63 = vsel %vm198_vm2, %v1957_v49, -inf }
 0x3ec   :  { %601 = vmax.xlane.f32.xlu1 %v600_v62  ;;  %604 = vmax.xlane.f32.xlu0 %v603_v63 }
 0x3f0   :  { %v533_v2 = vpop.f32.mrb[8].mxu1  ;;  %v582_v3 = vpop.f32.mrb[20].mxu0 }
 0x3f1   :  { %v534_v4 = vadd.f32 %v533_v2, %v194_v20  ;;  %v1962_v5 = vadd.f32 %v582_v3, %v194_v20  ;;  %v1563_v6 = vpop.f32.mrb[9].mxu1  ;;  %v1569_v7 = vpop.f32.mrb[21].mxu0 }
 0x3f2   :  { %v536_v8 = vpop.f32.mrb[10].mxu1  ;;  %v585_v9 = vpop.f32.mrb[22].mxu0 }
 0x3f3   :  { %v1564_v10 = vpop.f32.mrb[11].mxu1  ;;  %v1570_v11 = vpop.f32.mrb[23].mxu0  ;;  %v606_v12 = vsel %vm198_vm2, %v534_v4, -inf  ;;  %v609_v13 = vsel %vm198_vm2, %v1962_v5, -inf }
 0x3f4   :  { %607 = vmax.xlane.f32.xlu1 %v606_v12  ;;  %610 = vmax.xlane.f32.xlu0 %v609_v13 }
 0x402   :  { %v590_v17 = vpop.xlane.xlu1 %589 }
 0x403   :  { %v612_v18 = vsub.f32 %v1950_v22, %v590_v17 }
 0x405   :  { %781 = vrot.lane.b32.xlu1 %v1884_v51, %s1760_s4  ;;  %v620_v20 = vmul.f32 1.442695, %v612_v18 }
 0x409   :  { %829 = vrot.lane.b32.xlu1 %v1882_v50, %s1760_s4 }
 0x40a   :  { %733 = vrot.lane.b32.xlu0 %v1879_v42, %s1760_s4  ;;  %v593_v14 = vpop.xlane.xlu0 %592 }
 0x40b   :  { %v613_v16 = vsub.f32 %v289_v28, %v593_v14 }
 0x40d   :  { %v622_v19 = vmul.f32 1.442695, %v613_v16 }
 0x40f   :  { %1714 = vpow2.f32 %v622_v19 }
 0x410   :  { %1716 = vpow2.f32 %v620_v20 }
 0x419   :  { %v1715_v21 = vpop.eup %1714 }
 0x41a   :  { %v639_v23 = vsel %vm198_vm2, %v1715_v21, 0.0  ;;  %v1975_v24 = vpop.eup %1716 }
 0x41b   :  { %v636_v50 = vsel %vm198_vm2, %v1975_v24, 0.0 }
 0x429   :  { %640 = vadd.xlane.f32.xlu0 %v639_v23 }
 0x42d   :  { %637 = vadd.xlane.f32.xlu1 %v636_v50 }
 0x43e   :  { %877 = vrot.lane.b32.xlu1 %v1890_v54, %s1760_s4 }
 0x471   :  { %v596_v42 = vpop.xlane.xlu0 %595 }
 0x472   :  { %v614_v51 = vsub.f32 %v338_v35, %v596_v42 }
 0x474   :  { %v624_v22 = vmul.f32 1.442695, %v614_v51 }
 0x475   :  { %v599_v25 = vpop.xlane.xlu0 %598 }
 0x476   :  { %1718 = vpow2.f32 %v624_v22  ;;  %v615_v26 = vsub.f32 %v387_v40, %v599_v25 }
 0x478   :  { %v626_v27 = vmul.f32 1.442695, %v615_v26 }
 0x479   :  { %v602_v28 = vpop.xlane.xlu1 %601  ;;  %v605_v31 = vpop.xlane.xlu0 %604 }
 0x47a   :  { %1720 = vpow2.f32 %v626_v27  ;;  %v616_v29 = vsub.f32 %v436_v48, %v602_v28  ;;  %v617_v46 = vsub.f32 %v1957_v49, %v605_v31 }
 0x47c   :  { %v628_v30 = vmul.f32 1.442695, %v616_v29  ;;  %v630_v47 = vmul.f32 1.442695, %v617_v46 }
 0x47e   :  { %1722 = vpow2.f32 %v628_v30 }
 0x480   :  { %v1981_v32 = vpop.eup %1718 }
 0x481   :  { %v608_v33 = vpop.xlane.xlu1 %607  ;;  %v611_v34 = vpop.xlane.xlu0 %610  ;;  %v642_v54 = vsel %vm198_vm2, %v1981_v32, 0.0 }
 0x482   :  { %v618_v36 = vsub.f32 %v534_v4, %v608_v33  ;;  %643 = vadd.xlane.f32.xlu1 %v642_v54  ;;  %v619_v48 = vsub.f32 %v1962_v5, %v611_v34 }
 0x484   :  { %v1985_v35 = vpop.eup %1720  ;;  %v632_v37 = vmul.f32 1.442695, %v618_v36  ;;  %v634_v52 = vmul.f32 1.442695, %v619_v48 }
 0x485   :  { %v734_v38 = vpop.permute.xlu0 %733  ;;  %v645_v39 = vsel %vm198_vm2, %v1985_v35, 0.0  ;;  %v782_v55 = vpop.permute.xlu1 %781 }
 0x486   :  { %1724 = vpow2.f32 %v632_v37  ;;  %v739_v40 = vsel %vm689_vm3, %v734_v38, 0  ;;  %646 = vadd.xlane.f32.xlu0 %v645_v39  ;;  %v787_v7 = vsel %vm689_vm3, %v782_v55, 0 }
 0x487   :  { %1578 = vmatpush3.bf16.msra.mxu0 %v739_v40  ;;  %1726 = vpow2.f32 %v630_v47 }
 0x488   :  { %v1990_v41 = vpop.eup %1722  ;;  %1589 = vmatprep.subr.bf16.mxu0 %v1754_v15  ;;  %1728 = vpow2.f32 %v634_v52 }
 0x489   :  { %v648_v43 = vsel %vm198_vm2, %v1990_v41, 0.0  ;;  %v830_v56 = vpop.permute.xlu1 %829 }
 0x48a   :  { %649 = vadd.xlane.f32.xlu1 %v648_v43  ;;  %v835_v4 = vsel %vm689_vm3, %v830_v56, 0 }
 0x490   :  { %v1995_v44 = vpop.eup %1724 }
 0x491   :  { %v654_v45 = vsel %vm198_vm2, %v1995_v44, 0.0  ;;  %v2005_v58 = vpop.eup %1726 }
 0x492   :  { %655 = vadd.xlane.f32.xlu1 %v654_v45  ;;  %v2009_v62 = vpop.eup %1728 }
 0x49c   :  { %925 = vrot.lane.b32.xlu0 %v1888_v53, %s1760_s4  ;;  %v651_v53 = vsel %vm198_vm2, %v2005_v58, 0.0 }
 0x4a3   :  { %973 = vrot.lane.b32.xlu1 %v1897_v60, %s1760_s4  ;;  %v657_v60 = vsel %vm198_vm2, %v2009_v62, 0.0 }
 0x4b6   :  { %v641_v57 = vpop.xlane.xlu0 %640 }
 0x4b7   :  { %1730 = vrcp.f32 %v641_v57 }
 0x4ba   :  { %v638_v61 = vpop.xlane.xlu1 %637 }
 0x4bb   :  { %1732 = vrcp.f32 %v638_v61  ;;  %652 = vadd.xlane.f32.xlu0 %v651_v53 }
 0x4be   :  { %v878_v8 = vpop.permute.xlu1 %877 }
 0x4bf   :  { %658 = vadd.xlane.f32.xlu0 %v657_v60  ;;  %v883_v17 = vsel %vm689_vm3, %v878_v8, 0 }
 0x4c1   :  { %v1731_v49 = vpop.eup %1730 }
 0x4c2   :  { %v669_v63 = vmul.f32 %v1731_v49, %v1715_v21 }
 0x4c4   :  { %v677_v2 = vpack.c.bf16 %v669_v63, %v669_v63 }
 0x4c5   :  { %v1733_v3 = vpop.eup %1732 }
 0x4c6   :  { %v668_v5 = vmul.f32 %v1733_v3, %v1975_v24  ;;  %1580 = vmatmul.mubr.msk.bf16.vlgmr.msra.gmra.mrb[24].mxu0 %vm198_vm2, %v677_v2 }
 0x4c7   :  { %1590 = vmatpush3.bf16.msra.mxu0 %v835_v4  ;;  %1591 = vmatprep.mubr.msk.bf16.mxu0 %vm1755_vm1, %v1754_v15  ;;  %v1698_v4 = vld [vmem:[%s2154_s5] sm:$0xff]  }
 0x4c8   :  { %v676_v6 = vpack.c.bf16 %v668_v5, %v668_v5  ;;  %1601 = vmatprep.subr.bf16.mxu0 %v1754_v15  ;;  %v1699_v5 = vld [vmem:[%s2154_s5 + $0x8] sm:$0xff]  }
 0x4ca   :  { %1574 = vmatmul.mubr.msk.bf16.vlgmr.msra.gmra.mrb[12].mxu1 %vm198_vm2, %v676_v6 }
 0x4cb   :  { %1584 = vmatpush3.bf16.msra.mxu1 %v787_v7  ;;  %1585 = vmatprep.mubr.msk.bf16.mxu1 %vm1755_vm1, %v1754_v15 }
 0x4cc   :  { %1595 = vmatprep.subr.bf16.mxu1 %v1754_v15 }
 0x4d5   :  { %1021 = vrot.lane.b32.xlu0 %v1895_v59, %s1760_s4 }
 0x50f   :  { %v644_v9 = vpop.xlane.xlu1 %643 }
 0x510   :  { %1734 = vrcp.f32 %v644_v9 }
 0x513   :  { %v647_v10 = vpop.xlane.xlu0 %646 }
 0x514   :  { %1736 = vrcp.f32 %v647_v10 }
 0x517   :  { %v650_v11 = vpop.xlane.xlu1 %649  ;;  %v926_v59 = vpop.permute.xlu0 %925 }
 0x518   :  { %1738 = vrcp.f32 %v650_v11  ;;  %v931_v24 = vsel %vm689_vm3, %v926_v59, 0 }
 0x51a   :  { %v1735_v12 = vpop.eup %1734 }
 0x51b   :  { %v670_v13 = vmul.f32 %v1735_v12, %v1981_v32 }
 0x51d   :  { %v678_v14 = vpack.c.bf16 %v670_v13, %v670_v13 }
 0x51e   :  { %v1737_v16 = vpop.eup %1736 }
 0x51f   :  { %v671_v18 = vmul.f32 %v1737_v16, %v1985_v35  ;;  %1586 = vmatmul.mubr.msk.bf16.vlgmr.msra.gmra.mrb[16].mxu1 %vm198_vm2, %v678_v14  ;;  %v656_v19 = vpop.xlane.xlu1 %655 }
 0x520   :  { %1596 = vmatpush3.bf16.msra.mxu1 %v883_v17  ;;  %1740 = vrcp.f32 %v656_v19  ;;  %1597 = vmatprep.mubr.msk.bf16.mxu1 %vm1755_vm1, %v1754_v15 }
 0x521   :  { %v679_v20 = vpack.c.bf16 %v671_v18, %v671_v18  ;;  %1607 = vmatprep.subr.bf16.mxu1 %v1754_v15 }
 0x522   :  { %v1739_v21 = vpop.eup %1738 }
 0x523   :  { %v672_v23 = vmul.f32 %v1739_v21, %v1990_v41  ;;  %1592 = vmatmul.mubr.msk.bf16.vlgmr.msra.gmra.mrb[28].mxu0 %vm198_vm2, %v679_v20  ;;  %v974_v50 = vpop.permute.xlu1 %973 }
 0x524   :  { %1602 = vmatpush3.bf16.msra.mxu0 %v931_v24  ;;  %1603 = vmatprep.mubr.msk.bf16.mxu0 %vm1755_vm1, %v1754_v15  ;;  %v979_v51 = vsel %vm689_vm3, %v974_v50, 0 }
 0x525   :  { %v680_v42 = vpack.c.bf16 %v672_v23, %v672_v23  ;;  %1613 = vmatprep.subr.bf16.mxu0 %v1754_v15 }
 0x527   :  { %1598 = vmatmul.mubr.msk.bf16.vlgmr.msra.gmra.mrb[20].mxu1 %vm198_vm2, %v680_v42 }
 0x528   :  { %1608 = vmatpush3.bf16.msra.mxu1 %v979_v51  ;;  %1609 = vmatprep.mubr.msk.bf16.mxu1 %vm1755_vm1, %v1754_v15 }
 0x529   :  { %1619 = vmatprep.subr.bf16.mxu1 %v1754_v15 }
 0x52a   :  { %v1741_v22 = vpop.eup %1740 }
 0x52b   :  { %v674_v25 = vmul.f32 %v1741_v22, %v1995_v44 }
 0x52d   :  { %v682_v26 = vpack.c.bf16 %v674_v25, %v674_v25 }
 0x52f   :  { %1610 = vmatmul.mubr.msk.bf16.vlgmr.msra.gmra.mrb[24].mxu1 %vm198_vm2, %v682_v26 }
 0x530   :  { %1623 = vmatprep.mubr.msk.bf16.mxu1 %vm1755_vm1, %v1754_v15  ;;  %1620 = vmatpush3.bf16.msra.mxu1 %v1698_v4  ;;  %v1451_v4 = vld [vmem:[%s2158_s8] ss:$0 sm:$0xff] }
 0x531   :  { %1621 = vmatprep.subr.bf16.mxu1 %v1754_v15 }
 0x534   :  { %1622 = vmatpush3.bf16.msra.mxu1 %v1699_v5 }
 0x535   :  { %1635 = vmatprep.subr.bf16.mxu1 %v1754_v15 }
 0x548   :  { %v653_v27 = vpop.xlane.xlu0 %652 }
 0x549   :  { %1742 = vrcp.f32 %v653_v27 }
 0x54c   :  { %v659_v28 = vpop.xlane.xlu0 %658 }
 0x54d   :  { %1744 = vrcp.f32 %v659_v28 }
 0x550   :  { %v1022_v31 = vpop.permute.xlu0 %1021 }
 0x551   :  { %v1027_v34 = vsel %vm689_vm3, %v1022_v31, 0 }
 0x553   :  { %v1743_v29 = vpop.eup %1742 }
 0x554   :  { %v673_v30 = vmul.f32 %v1743_v29, %v2005_v58 }
 0x556   :  { %v681_v32 = vpack.c.bf16 %v673_v30, %v673_v30  ;;  %v1449_v30 = vld [vmem:[%s2155_s6] ss:$0 sm:$0xff] }
 0x557   :  { %v1745_v33 = vpop.eup %1744 }
 0x558   :  { %1604 = vmatmul.mubr.msk.bf16.vlgmr.msra.gmra.mrb[32].mxu0 %vm198_vm2, %v681_v32  ;;  %v675_v54 = vmul.f32 %v1745_v33, %v2009_v62 }
 0x559   :  { %1614 = vmatpush3.bf16.msra.mxu0 %v1027_v34  ;;  %1615 = vmatprep.mubr.msk.bf16.mxu0 %vm1755_vm1, %v1754_v15 }
 0x55a   :  { %1627 = vmatprep.subr.bf16.mxu0 %v1754_v15  ;;  %v683_v36 = vpack.c.bf16 %v675_v54, %v675_v54 }
 0x560   :  { %1616 = vmatmul.mubr.msk.bf16.vlgmr.msra.gmra.mrb[36].mxu0 %vm198_vm2, %v683_v36 }
 0x561   :  { %1631 = vmatprep.mubr.msk.bf16.mxu0 %vm1755_vm1, %v1754_v15 }
 0x599   :  { %v775_v35 = vpop.f32.mrb[24].mxu0 }
 0x59a   :  { %v1581_v37 = vpop.f32.mrb[25].mxu0 }
 0x59b   :  { %v778_v38 = vpop.f32.mrb[26].mxu0 }
 0x59c   :  { %v1582_v39 = vpop.f32.mrb[27].mxu0 }
 0x59d   :  { %v727_v40 = vpop.f32.mrb[12].mxu1 }
 0x59e   :  { %v1575_v41 = vpop.f32.mrb[13].mxu1 }
 0x59f   :  { %v730_v43 = vpop.f32.mrb[14].mxu1 }
 0x5a0   :  { %v1576_v44 = vpop.f32.mrb[15].mxu1 }
 0x5f2   :  { %v823_v45 = vpop.f32.mrb[16].mxu1 }
 0x5f3   :  { %v1587_v46 = vpop.f32.mrb[17].mxu1 }
 0x5f4   :  { %v826_v47 = vpop.f32.mrb[18].mxu1 }
 0x5f5   :  { %v1588_v48 = vpop.f32.mrb[19].mxu1 }
 0x5f6   :  { %v871_v52 = vpop.f32.mrb[28].mxu0  ;;  %v1700_v48 = vld [vmem:[%s2156_s9] sm:$0xff]  }
 0x5f7   :  { %v1681_v55 = vpack.i.bf16 %v871_v52, %v823_v45  ;;  %v1593_v56 = vpop.f32.mrb[29].mxu0  ;;  %1628 = vmatpush3.bf16.msra.mxu0 %v1700_v48  ;;  %v1701_v52 = vld [vmem:[%s2156_s9 + $0x8] sm:$0xff]  }
 0x5f8   :  { %v874_v57 = vpop.f32.mrb[30].mxu0  ;;  %1629 = vmatprep.subr.bf16.mxu0 %v1754_v15 }
 0x5f9   :  { %1682 = vrot.lane.b32.xlu1 %v1681_v55, %s1762_s22  ;;  %v1594_v58 = vpop.f32.mrb[31].mxu0 }
 0x5fa   :  { %v919_v61 = vpop.f32.mrb[20].mxu1 }
 0x5fb   :  { %v1599_v53 = vpop.f32.mrb[21].mxu1  ;;  %1630 = vmatpush3.bf16.msra.mxu0 %v1701_v52 }
 0x5fc   :  { %v922_v62 = vpop.f32.mrb[22].mxu1 }
 0x5fd   :  { %v1600_v60 = vpop.f32.mrb[23].mxu1 }
 0x602   :  { %v1015_v49 = vpop.f32.mrb[24].mxu1 }
 0x603   :  { %v1611_v63 = vpop.f32.mrb[25].mxu1 }
 0x604   :  { %v1018_v2 = vpop.f32.mrb[26].mxu1 }
 0x605   :  { %v1612_v3 = vpop.f32.mrb[27].mxu1 }
 0x62b   :  { %v967_v6 = vpop.f32.mrb[32].mxu0 }
 0x62c   :  { %v1686_v7 = vpack.i.bf16 %v967_v6, %v919_v61  ;;  %v1605_v8 = vpop.f32.mrb[33].mxu0 }
 0x62d   :  { %v970_v9 = vpop.f32.mrb[34].mxu0 }
 0x62e   :  { %1687 = vrot.lane.b32.xlu0 %v1686_v7, %s1763_s27  ;;  %v1606_v10 = vpop.f32.mrb[35].mxu0  ;;  %v1702_v9 = vld [vmem:[%s2159_s11] sm:$0xff]  }
 0x62f   :  { %v1703_v10 = vld [vmem:[%s2159_s11 + $0x8] sm:$0xff]  }
 0x633   :  { %v1063_v11 = vpop.f32.mrb[36].mxu0 }
 0x634   :  { %v1691_v12 = vpack.i.bf16 %v1063_v11, %v1015_v49  ;;  %v1617_v13 = vpop.f32.mrb[37].mxu0  ;;  %v1450_v49 = vld [vmem:[%s2157_s7] ss:$0 sm:$0xff]  ;;  %v1704_v11 = vld [vmem:[%s2159_s11 + $0x10] sm:$0xff]  }
 0x635   :  { %v1066_v14 = vpop.f32.mrb[38].mxu0  ;;  %v1706_v13 = vld [vmem:[%s2159_s11 + $0x20] sm:$0xff]  }
 0x636   :  { %1692 = vrot.lane.b32.xlu1 %v1691_v12, %s1764_s28  ;;  %v1618_v16 = vpop.f32.mrb[39].mxu0  ;;  %v1705_v12 = vld [vmem:[%s2159_s11 + $0x18] sm:$0xff]   ;;  %v1707_v14 = vld [vmem:[%s2159_s11 + $0x28] sm:$0xff]  }
 0x637   :  { %v1708_v16 = vld [vmem:[%s2159_s11 + $0x30] sm:$0xff]  }
 0x66b   :  { %v1683_v17 = vpop.permute.xlu1 %1682 }
 0x66c   :  { %v1685_v19 = vunpack.i.h.bf16 %v1683_v17  ;;  %v1684_v59 = vunpack.i.l.bf16 %v1683_v17  ;;  %v1709_v17 = vld [vmem:[%s2159_s11 + $0x38] sm:$0xff]  }
 0x66e   :  { %v1094_v24 = vsel %vm198_vm2, %v775_v35, %v1685_v19  ;;  %v1093_v50 = vsel %vm198_vm2, %v727_v40, %v1684_v59 }
 0x6a0   :  { %v1688_v18 = vpop.permute.xlu0 %1687 }
 0x6a1   :  { %v1690_v20 = vunpack.i.h.bf16 %v1688_v18  ;;  %v1689_v21 = vunpack.i.l.bf16 %v1688_v18  ;;  %v1452_v18 = vld [vmem:[%s2160_s10] ss:$0 sm:$0xff] }
 0x6a3   :  { %v1097_v22 = vsel %vm1095_vm5, %v1094_v24, %v1690_v20  ;;  %v1096_v25 = vsel %vm1095_vm5, %v1093_v50, %v1689_v21 }
 0x6a8   :  { %v1693_v23 = vpop.permute.xlu1 %1692 }
 0x6a9   :  { %v1695_v42 = vunpack.i.h.bf16 %v1693_v23  ;;  %v1694_v51 = vunpack.i.l.bf16 %v1693_v23 }
 0x6ab   :  { %v1100_v26 = vsel %vm1098_vm6, %v1097_v22, %v1695_v42  ;;  %v1099_v27 = vsel %vm1098_vm6, %v1096_v25, %v1694_v51 }
 0x6ac   :  { %v1101_v28 = vpack.c.bf16 %v1100_v26, %v1099_v27 }
 0x6ae   :  { %1624 = vmatmul.mubr.msk.bf16.vlgmr.msra.gmra.mrb[28].mxu1 %vm49_vm0, %v1101_v28 }
 0x6af   :  { %1651 = vmatprep.mubr.msk.bf16.mxu1 %vm1755_vm1, %v1754_v15  ;;  %1636 = vmatpush3.bf16.msra.mxu1 %v1702_v9 }
 0x6b0   :  { %1637 = vmatprep.subr.bf16.mxu1 %v1754_v15 }
 0x6b3   :  { %1638 = vmatpush3.bf16.msra.mxu1 %v1703_v10 }
 0x6b4   :  { %1639 = vmatprep.subr.bf16.mxu1 %v1754_v15 }
 0x6b7   :  { %1640 = vmatpush3.bf16.msra.mxu1 %v1704_v11 }
 0x6b8   :  { %1641 = vmatprep.subr.bf16.mxu1 %v1754_v15 }
 0x6bb   :  { %1642 = vmatpush3.bf16.msra.mxu1 %v1705_v12 }
 0x6bc   :  { %1643 = vmatprep.subr.bf16.mxu1 %v1754_v15 }
 0x6bf   :  { %1644 = vmatpush3.bf16.msra.mxu1 %v1706_v13 }
 0x6c0   :  { %1645 = vmatprep.subr.bf16.mxu1 %v1754_v15 }
 0x6c3   :  { %1646 = vmatpush3.bf16.msra.mxu1 %v1707_v14 }
 0x6c4   :  { %1647 = vmatprep.subr.bf16.mxu1 %v1754_v15 }
 0x6c7   :  { %1648 = vmatpush3.bf16.msra.mxu1 %v1708_v16 }
 0x6c8   :  { %1649 = vmatprep.subr.bf16.mxu1 %v1754_v15 }
 0x6cb   :  { %1650 = vmatpush3.bf16.msra.mxu1 %v1709_v17 }
 0x781   :  { %v1155_v29 = vpop.f32.mrb[28].mxu1 }
 0x782   :  { %v1162_v31 = vadd.f32 %v1155_v29, %v1838_v0  ;;  %v1625_v32 = vpop.f32.mrb[29].mxu1 }
 0x783   :  { %v1158_v33 = vpop.f32.mrb[30].mxu1 }
 0x784   :  { %v2075_v34 = vadd.f32 %v1449_v30, %v1162_v31  ;;  %v1163_v54 = vadd.f32 %v1158_v33, %v1843_v1  ;;  %v1626_v36 = vpop.f32.mrb[31].mxu1 }
 0x786   :  { %v2078_v35 = vadd.f32 %v1449_v30, %v1163_v54  ;;  %v1175_v37 = vsel %vm49_vm0, %v2075_v34, 0.0 }
 0x787   :  { %1176 = vadd.xlane.f32.xlu0 %v1175_v37 }
 0x788   :  { %v1178_v38 = vsel %vm49_vm0, %v2078_v35, 0.0 }
 0x789   :  { %1179 = vadd.xlane.f32.xlu1 %v1178_v38 }
 0x814   :  { %v1177_v39 = vpop.xlane.xlu0 %1176 }
 0x815   :  { %v1181_v40 = vmul.f32 0.03125, %v1177_v39 }
 0x816   :  { %v1180_v0 = vpop.xlane.xlu1 %1179 }
 0x817   :  { %v1183_v41 = vsub.f32 %v2075_v34, %v1181_v40  ;;  %v1182_v43 = vmul.f32 0.03125, %v1180_v0  ;;  %v1456_v40 = vld [vmem:[%s2161_s12] ss:$0 sm:$0xff] }
 0x819   :  { %v1184_v44 = vsub.f32 %v2078_v35, %v1182_v43  ;;  %v1185_v1 = vmul.f32 %v1183_v41, %v1183_v41 }
 0x81b   :  { %v1187_v45 = vsel %vm49_vm0, %v1185_v1, 0.0  ;;  %v1186_v46 = vmul.f32 %v1184_v44, %v1184_v44 }
 0x81c   :  { %1188 = vadd.xlane.f32.xlu0 %v1187_v45 }
 0x81d   :  { %v1190_v47 = vsel %vm49_vm0, %v1186_v46, 0.0 }
 0x820   :  { %1191 = vadd.xlane.f32.xlu0 %v1190_v47 }
 0x8a9   :  { %v1189_v55 = vpop.xlane.xlu0 %1188 }
 0x8aa   :  { %v1193_v56 = vmul.f32 0.03125, %v1189_v55 }
 0x8ac   :  { %v1195_v57 = vadd.f32 1e-05, %v1193_v56 }
 0x8ad   :  { %v1192_v58 = vpop.xlane.xlu0 %1191 }
 0x8ae   :  { %1746 = vrsqrt.f32 %v1195_v57  ;;  %v1194_v61 = vmul.f32 0.03125, %v1192_v58 }
 0x8b0   :  { %v1196_v53 = vadd.f32 1e-05, %v1194_v61 }
 0x8b2   :  { %1748 = vrsqrt.f32 %v1196_v53 }
 0x8b8   :  { %v1747_v62 = vpop.eup %1746 }
 0x8b9   :  { %v1199_v60 = vmul.f32 %v1747_v62, %v1183_v41 }
 0x8bb   :  { %v1207_v2 = vmul.f32 %v1450_v49, %v1199_v60 }
 0x8bc   :  { %v1749_v63 = vpop.eup %1748 }
 0x8bd   :  { %v1200_v3 = vmul.f32 %v1749_v63, %v1184_v44  ;;  %v1215_v6 = vadd.f32 %v1451_v4, %v1207_v2 }
 0x8bf   :  { %v1208_v5 = vmul.f32 %v1450_v49, %v1200_v3 }
 0x8c1   :  { %v1216_v7 = vadd.f32 %v1451_v4, %v1208_v5 }
 0x8c3   :  { %v1217_v8 = vpack.c.bf16 %v1216_v7, %v1215_v6 }
 0x8c5   :  { %1632 = vmatmul.mubr.msk.bf16.vlgmr.msra.gmra.mrb[40].mxu0 %vm49_vm0, %v1217_v8 }
 0x998   :  { %v1278_v19 = vpop.f32.mrb[40].mxu0 }
 0x999   :  { %v1279_v59 = vadd.f32 %v1452_v18, %v1278_v19  ;;  %v1633_v20 = vpop.f32.mrb[41].mxu0 }
 0x99a   :  { %v1281_v21 = vpop.f32.mrb[42].mxu0 }
 0x99b   :  { %v1287_v23 = vmul.f32 0.044715, %v1279_v59  ;;  %v1282_v24 = vadd.f32 %v1452_v18, %v1281_v21  ;;  %v1634_v50 = vpop.f32.mrb[43].mxu0  ;;  %v1285_v33 = vmul.f32 0.5, %v1279_v59 }
 0x99d   :  { %v1289_v42 = vmul.f32 %v1287_v23, %v1279_v59  ;;  %v1288_v51 = vmul.f32 0.044715, %v1282_v24  ;;  %v1286_v54 = vmul.f32 0.5, %v1282_v24 }
 0x99f   :  { %v1291_v22 = vmul.f32 %v1289_v42, %v1279_v59  ;;  %v1290_v25 = vmul.f32 %v1288_v51, %v1282_v24 }
 0x9a1   :  { %v1293_v26 = vadd.f32 %v1291_v22, %v1279_v59  ;;  %v1292_v27 = vmul.f32 %v1290_v25, %v1282_v24 }
 0x9a3   :  { %v1295_v28 = vmul.f32 0.7978846, %v1293_v26  ;;  %v1294_v15 = vadd.f32 %v1292_v27, %v1282_v24 }
 0x9a5   :  { %1750 = vtanh.f32 %v1295_v28  ;;  %v1296_v29 = vmul.f32 0.7978846, %v1294_v15 }
 0x9a7   :  { %1752 = vtanh.f32 %v1296_v29 }
 0x9af   :  { %v1751_v30 = vpop.eup %1750 }
 0x9b0   :  { %v1299_v31 = vadd.f32 1.0, %v1751_v30 }
 0x9b1   :  { %v1753_v32 = vpop.eup %1752 }
 0x9b2   :  { %v1300_v36 = vadd.f32 1.0, %v1753_v32  ;;  %v1301_v37 = vmul.f32 %v1299_v31, %v1285_v33 }
 0x9b4   :  { %v1302_v38 = vmul.f32 %v1300_v36, %v1286_v54 }
 0x9b6   :  { %v1303_v39 = vpack.c.bf16 %v1302_v38, %v1301_v37 }
 0x9b8   :  { %1652 = vmatmul.mubr.bf16.vlgmr.msra.gmra.mrb[32].mxu1 %v1303_v39 }
 0xa8b   :  { %v1409_v0 = vpop.f32.mrb[32].mxu1 }
 0xa8c   :  { %v1410_v41 = vadd.f32 %v1456_v40, %v1409_v0  ;;  %v1653_v43 = vpop.f32.mrb[33].mxu1 }
 0xa8d   :  { %v1412_v44 = vpop.f32.mrb[34].mxu1 }
 0xa8e   :  { %v1416_v1 = vadd.f32 %v1410_v41, %v2075_v34  ;;  %v1413_v45 = vadd.f32 %v1456_v40, %v1412_v44  ;;  %v1654_v46 = vpop.f32.mrb[35].mxu1 }
 0xa90   :  { %1418 = vst.msk [vmem:[%s2162_s13] sm:$0xff] %vm49_vm0, %v1416_v1  ;;  %v1417_v47 = vadd.f32 %v1413_v45, %v2078_v35 }
 0xa92   :  { %1419 = vst.msk [vmem:[%s2162_s13 + $0x8] sm:$0xff] %vm49_vm0, %v1417_v47 }

</bundles_post_ra>
